<compile_context>
chip_gen: v7x
topology: tpu7x:2x2x1
jax: 0.10.0
libtpu: 0.0.40
codegen_flags: <defaults>
</compile_context>

<pallas_src>
import functools

import jax
import jax.numpy as jnp
from jax.experimental import pallas as pl
from jax.experimental.pallas import tpu as pltpu


def _round_up(x, m):
    return ((x + m - 1) // m) * m


def _cdiv(a, b):
    return (a + b - 1) // b


def _gcn_kernel(adj_ref, x_ref, w_ref, b_ref, o_ref, acc_ref, *, n, tk):
    """Fused (adj @ x) @ W + b for one (row-tile, k-tile) grid point."""
    k = pl.program_id(1)

    @pl.when(k == 0)
    def _():
        acc_ref[...] = jnp.zeros_like(acc_ref)

    adj = adj_ref[...]
    x = x_ref[...]

    # Ragged contraction tail: zero the out-of-range adj columns AND x rows so
    # stale VMEM in the partial block (possibly NaN) never reaches the MXU.
    # Static check: only emitted when N is not a multiple of the k tile.
    if n % tk != 0:
        k0 = k * tk
        col = jax.lax.broadcasted_iota(jnp.int32, adj.shape, 1) + k0
        adj = jnp.where(col < n, adj, jnp.zeros_like(adj))
        row = jax.lax.broadcasted_iota(jnp.int32, x.shape, 0) + k0
        x = jnp.where(row < n, x, jnp.zeros_like(x))

    # First matmul: native-dtype operands (bf16 x bf16 -> f32 on the MXU),
    # f32 accumulation in the persistent scratch.
    acc_ref[...] += jnp.dot(adj, x, preferred_element_type=jnp.float32)

    # On the last contraction step, apply the (tiny) second matmul + bias.
    @pl.when(k == pl.num_programs(1) - 1)
    def _():
        y = jnp.dot(acc_ref[...], w_ref[...], preferred_element_type=jnp.float32)
        y = y + b_ref[...]
        o_ref[...] = y.astype(o_ref.dtype)


def _vmem_footprint_bytes(tm, tk, c_in, c_out, in_bytes, w_bytes, out_bytes,
                          adj_buffers):
    """VMEM footprint with lane-padded narrow blocks (last dim -> 128 lanes)."""
    def pad2(r, c, nbytes):
        return _round_up(r, 8) * _round_up(c, 128) * nbytes

    total = 0
    total += adj_buffers * pad2(tm, tk, in_bytes)      # adj stream (multi-buffered)
    total += 2 * pad2(tk, c_in, in_bytes)              # x tiles (double-buffered)
    total += 2 * pad2(c_in, c_out, w_bytes)            # weight (resident)
    total += 2 * pad2(1, c_out, w_bytes)               # bias (resident)
    total += 2 * pad2(tm, c_out, out_bytes)            # output tiles
    total += pad2(tm, c_in, 4)                         # f32 accumulator scratch
    return total


def gcn_conv_forward(x, adj, weight, bias, *, tile_m=1024, tile_k=1024,
                     adj_buffers=2, out_dtype=None, vmem_limit_bytes=None):
    """GCNConv forward: adj @ x @ weight + bias.

    x      : [N, C_in]   (pass bf16 together with bf16 adj for ~2x on the HBM-bound stream)
    adj    : [N, N]
    weight : [C_in, C_out]
    bias   : [C_out]
    returns: [N, C_out] in promote_types(x.dtype, weight.dtype) unless out_dtype given
    """
    N, c_in = x.shape
    assert adj.shape == (N, N), "adj must be [N, N]"
    assert weight.shape[0] == c_in
    c_out = weight.shape[1]

    # adj is the HBM-dominant operand; match x (tiny) to its dtype so the MXU
    # sees a single native dtype rather than a promoted mixed-precision path.
    if x.dtype != adj.dtype:
        x = x.astype(adj.dtype)
    if out_dtype is None:
        out_dtype = jnp.promote_types(x.dtype, weight.dtype)

    bias2d = bias.reshape(1, c_out)

    # Tile sizes: large by default (bandwidth amortization), clamped to the
    # 128-rounded problem size, aligned to (8, 128) hardware tiling.
    cap = _round_up(N, 128)
    tm = _round_up(min(tile_m, cap), 8)
    tk = _round_up(min(tile_k, cap), 128)
    # v7x megacore: the "parallel" row axis shards across two TensorCores, so
    # prefer >= 2 row tiles when the problem is big enough to split.
    while _cdiv(N, tm) < 2 and tm >= 256:
        tm = max(_round_up(tm // 2, 8), 128)

    grid = (_cdiv(N, tm), _cdiv(N, tk))

    # Generation-aware VMEM budgeting: always pass an explicit limit derived
    # from the (lane-padded) footprint so big tiles work under v5e's 16 MiB
    # scoped default and stay inside v7x's 64 MiB physical VMEM.
    if vmem_limit_bytes is None:
        fp = _vmem_footprint_bytes(
            tm, tk, c_in, c_out,
            adj.dtype.itemsize, weight.dtype.itemsize,
            jnp.dtype(out_dtype).itemsize, max(adj_buffers, 2))
        vmem_limit_bytes = max(int(fp * 1.25) + (4 << 20), 16 << 20)

    adj_spec_kwargs = {}
    if adj_buffers and adj_buffers > 2:
        # Optional deeper pipelining of the adj DMA stream (sweepable).
        adj_spec_kwargs["pipeline_mode"] = pl.Buffered(adj_buffers)

    kernel = functools.partial(_gcn_kernel, n=N, tk=tk)

    out = pl.pallas_call(
        kernel,
        out_shape=jax.ShapeDtypeStruct((N, c_out), out_dtype),
        grid=grid,
        in_specs=[
            pl.BlockSpec((tm, tk), lambda i, k: (i, k), **adj_spec_kwargs),  # adj tile
            pl.BlockSpec((tk, c_in), lambda i, k: (k, 0)),                   # x tile
            pl.BlockSpec((c_in, c_out), lambda i, k: (0, 0)),                # weight (resident)
            pl.BlockSpec((1, c_out), lambda i, k: (0, 0)),                   # bias (resident)
        ],
        out_specs=pl.BlockSpec((tm, c_out), lambda i, k: (i, 0)),
        scratch_shapes=[pltpu.VMEM((tm, c_in), jnp.float32)],                # adj@x accumulator
        compiler_params=pltpu.CompilerParams(
            dimension_semantics=("parallel", "arbitrary"),
            vmem_limit_bytes=vmem_limit_bytes,
        ),
    )(adj, x, weight, bias2d)

    return out


def _reference_forward(x, adj, weight, bias):
    return (adj @ x) @ weight + bias


if __name__ == "__main__":
    # Small, module-consistent shapes.  N is a non-multiple of the tile size so
    # the ragged-tail masking path is exercised; explicit 128 tiles exercise
    # the multi-step k accumulation.
    N = 200
    in_channels = 32
    out_channels = 32

    key = jax.random.PRNGKey(0)
    kx, ka, kw, kb = jax.random.split(key, 4)

    x = jax.random.normal(kx, (N, in_channels), dtype=jnp.float32)
    # Row-normalized nonnegative adjacency (GCN-like), keeps magnitudes tame.
    adj_raw = jax.random.uniform(ka, (N, N), jnp.float32, 0.0, 1.0)
    adj = adj_raw / adj_raw.sum(axis=1, keepdims=True)

    # Glorot-style weight; small random bias (module inits bias to zeros, but a
    # nonzero bias actually exercises the bias-add path).
    std = (2.0 / (in_channels + out_channels)) ** 0.5
    weight = std * jax.random.normal(kw, (in_channels, out_channels), jnp.float32)
    bias = 0.01 * jax.random.normal(kb, (out_channels,), jnp.float32)

    ref = _reference_forward(x, adj, weight, bias)

    # 1) f32 path, small explicit tiles -> multi-step accumulation + ragged tails.
    out = gcn_conv_forward(x, adj, weight, bias, tile_m=128, tile_k=128)
    out = jax.block_until_ready(out)
    assert out.shape == (N, out_channels)
    assert jnp.allclose(out, ref, atol=1e-4, rtol=1e-4), "f32 mismatch vs JAX reference"

    # 2) bf16 streaming path (adj/x stored bf16 upstream), default large tiles
    #    (clamped to the problem size here).  Output stays f32 via the f32
    #    accumulator + f32 weights.
    out_bf16 = gcn_conv_forward(
        x.astype(jnp.bfloat16), adj.astype(jnp.bfloat16), weight, bias)
    out_bf16 = jax.block_until_ready(out_bf16)
    assert out_bf16.dtype == jnp.float32
    assert jnp.allclose(out_bf16, ref, atol=5e-2, rtol=5e-2), "bf16 mismatch vs JAX reference"

    print("KERNEL_OK")
</pallas_src>

<mosaic_0001>
module attributes {stable_mosaic.version = 11 : i64} {
  func.func @_gcn_kernel(%arg0: i32, %arg1: i32, %arg2: memref<128x128xf32, #tpu.memory_space<vmem>>, %arg3: memref<128x32xf32, #tpu.memory_space<vmem>>, %arg4: memref<32x32xf32, #tpu.memory_space<vmem>>, %arg5: memref<1x32xf32, #tpu.memory_space<vmem>>, %arg6: memref<128x32xf32, #tpu.memory_space<vmem>>, %arg7: memref<128x32xf32, #tpu.memory_space<vmem>>) attributes {dimension_semantics = [#tpu.dimension_semantics<parallel>, #tpu.dimension_semantics<arbitrary>], iteration_bounds = array<i64: 2, 2>, scalar_prefetch = 0 : i64, scratch_operands = 1 : i64, tpu.core_type = #tpu.core_type<tc>, window_params = [{transform_indices = @transform_0, window_bounds = array<i64: 128, 128>}, {transform_indices = @transform_1, window_bounds = array<i64: 128, 32>}, {pipeline_mode = #tpu.pipeline_mode<synchronous>, transform_indices = @transform_2, window_bounds = array<i64: 32, 32>}, {pipeline_mode = #tpu.pipeline_mode<synchronous>, transform_indices = @transform_3, window_bounds = array<i64: 1, 32>}, {transform_indices = @transform_4, window_bounds = array<i64: 128, 32>}]} {
    %c0_i32 = arith.constant 0 : i32
    %0 = arith.cmpi eq, %arg1, %c0_i32 : i32
    %1 = arith.extui %0 : i1 to i32
    %c0_i32_0 = arith.constant 0 : i32
    %2 = arith.cmpi ne, %1, %c0_i32_0 : i32
    scf.if %2 {
      %cst_12 = arith.constant 0.000000e+00 : f32
      %27 = vector.broadcast %cst_12 : f32 to vector<128x32xf32>
      %c0_13 = arith.constant 0 : index
      %c0_14 = arith.constant 0 : index
      %28 = vector.load %arg7[%c0_13, %c0_14] : memref<128x32xf32, #tpu.memory_space<vmem>>, vector<128x32xf32>
      tpu.vector_store %arg7[%c0_13, %c0_14], %27 {strides = array<i32>} : memref<128x32xf32, #tpu.memory_space<vmem>>, vector<128x32xf32>,
    } else {
    }
    %c0 = arith.constant 0 : index
    %c0_1 = arith.constant 0 : index
    %3 = vector.load %arg2[%c0, %c0_1] : memref<128x128xf32, #tpu.memory_space<vmem>>, vector<128x128xf32>
    %c0_2 = arith.constant 0 : index
    %c0_3 = arith.constant 0 : index
    %4 = vector.load %arg3[%c0_2, %c0_3] : memref<128x32xf32, #tpu.memory_space<vmem>>, vector<128x32xf32>
    %c128_i32 = arith.constant 128 : i32
    %5 = arith.muli %arg1, %c128_i32 : i32
    %6 = tpu.iota {dimensions = array<i32: 1>} : vector<128x128xi32>
    %7 = vector.broadcast %5 : i32 to vector<128x128xi32>
    %8 = arith.addi %6, %7 : vector<128x128xi32>
    %c200_i32 = arith.constant 200 : i32
    %9 = vector.broadcast %c200_i32 : i32 to vector<128x128xi32>
    %10 = arith.cmpi slt, %8, %9 : vector<128x128xi32>
    %cst = arith.constant 0.000000e+00 : f32
    %11 = vector.broadcast %cst : f32 to vector<128x128xf32>
    %12 = arith.select %10, %3, %11 : vector<128x128xi1>, vector<128x128xf32>
    %13 = tpu.iota {dimensions = array<i32: 0>} : vector<128x32xi32>
    %14 = vector.broadcast %5 : i32 to vector<128x32xi32>
    %15 = arith.addi %13, %14 : vector<128x32xi32>
    %c200_i32_4 = arith.constant 200 : i32
    %16 = vector.broadcast %c200_i32_4 : i32 to vector<128x32xi32>
    %17 = arith.cmpi slt, %15, %16 : vector<128x32xi32>
    %cst_5 = arith.constant 0.000000e+00 : f32
    %18 = vector.broadcast %cst_5 : f32 to vector<128x32xf32>
    %19 = arith.select %17, %4, %18 : vector<128x32xi1>, vector<128x32xf32>
    %c0_6 = arith.constant 0 : index
    %c0_7 = arith.constant 0 : index
    %20 = vector.load %arg7[%c0_6, %c0_7] : memref<128x32xf32, #tpu.memory_space<vmem>>, vector<128x32xf32>
    %cst_8 = arith.constant dense<0.000000e+00> : vector<128x32xf32>
    %21 = tpu.matmul %12, %19, %cst_8 {dimension_numbers = #tpu.dot_dimension_numbers<[1], [0], [0], [1], [0, 0, 1, 1], [], []>} : vector<128x128xf32>, vector<128x32xf32>, vector<128x32xf32> -> vector<128x32xf32>
    %22 = arith.addf %20, %21 : vector<128x32xf32>
    %c0_9 = arith.constant 0 : index
    %c0_10 = arith.constant 0 : index
    %23 = vector.load %arg7[%c0_9, %c0_10] : memref<128x32xf32, #tpu.memory_space<vmem>>, vector<128x32xf32>
    tpu.vector_store %arg7[%c0_9, %c0_10], %22 {strides = array<i32>} : memref<128x32xf32, #tpu.memory_space<vmem>>, vector<128x32xf32>,
    %c1_i32 = arith.constant 1 : i32
    %24 = arith.cmpi eq, %arg1, %c1_i32 : i32
    %25 = arith.extui %24 : i1 to i32
    %c0_i32_11 = arith.constant 0 : i32
    %26 = arith.cmpi ne, %25, %c0_i32_11 : i32
    scf.if %26 {
      %c0_12 = arith.constant 0 : index
      %c0_13 = arith.constant 0 : index
      %27 = vector.load %arg7[%c0_12, %c0_13] : memref<128x32xf32, #tpu.memory_space<vmem>>, vector<128x32xf32>
      %c0_14 = arith.constant 0 : index
      %c0_15 = arith.constant 0 : index
      %28 = vector.load %arg4[%c0_14, %c0_15] : memref<32x32xf32, #tpu.memory_space<vmem>>, vector<32x32xf32>
      %cst_16 = arith.constant dense<0.000000e+00> : vector<128x32xf32>
      %29 = tpu.matmul %27, %28, %cst_16 {dimension_numbers = #tpu.dot_dimension_numbers<[1], [0], [0], [1], [0, 0, 1, 1], [], []>} : vector<128x32xf32>, vector<32x32xf32>, vector<128x32xf32> -> vector<128x32xf32>
      %c0_17 = arith.constant 0 : index
      %c0_18 = arith.constant 0 : index
      %30 = vector.load %arg5[%c0_17, %c0_18] : memref<1x32xf32, #tpu.memory_space<vmem>>, vector<1x32xf32>
      %31 = vector.broadcast %30 : vector<1x32xf32> to vector<128x32xf32>
      %32 = arith.addf %29, %31 : vector<128x32xf32>
      %c0_19 = arith.constant 0 : index
      %c0_20 = arith.constant 0 : index
      %33 = vector.load %arg6[%c0_19, %c0_20] : memref<128x32xf32, #tpu.memory_space<vmem>>, vector<128x32xf32>
      tpu.vector_store %arg6[%c0_19, %c0_20], %32 {strides = array<i32>} : memref<128x32xf32, #tpu.memory_space<vmem>>, vector<128x32xf32>,
    } else {
    }
    return
  }
  func.func @transform_0(%arg0: i32, %arg1: i32) -> (i32, i32) {
    %c0_i32 = arith.constant 0 : i32
    return %arg0, %arg1 : i32, i32
  }
  func.func @transform_1(%arg0: i32, %arg1: i32) -> (i32, i32) {
    %c0_i32 = arith.constant 0 : i32
    %c0_i32_0 = arith.constant 0 : i32
    return %arg1, %c0_i32 : i32, i32
  }
  func.func @transform_2(%arg0: i32, %arg1: i32) -> (i32, i32) {
    %c0_i32 = arith.constant 0 : i32
    %c0_i32_0 = arith.constant 0 : i32
    %c0_i32_1 = arith.constant 0 : i32
    return %c0_i32, %c0_i32_0 : i32, i32
  }
  func.func @transform_3(%arg0: i32, %arg1: i32) -> (i32, i32) {
    %c0_i32 = arith.constant 0 : i32
    %c0_i32_0 = arith.constant 0 : i32
    %c0_i32_1 = arith.constant 0 : i32
    return %c0_i32, %c0_i32_0 : i32, i32
  }
  func.func @transform_4(%arg0: i32, %arg1: i32) -> (i32, i32) {
    %c0_i32 = arith.constant 0 : i32
    %c0_i32_0 = arith.constant 0 : i32
    return %arg0, %c0_i32 : i32, i32
  }
}

</mosaic_0001>

<bundles_post_ra>
// kernel: tpu_custom_call.1
= control target key start
LH: loop header
LB: loop body
LE: loop exit
PB: predicated region body
PF: predicated region fallthrough
CT: control target
= control target key end

     0   :  { %9 = vsyncpa [#allocation4], 0  ;;  %s2364_s0 = inlined_call_operand.hbm [shape: f32[200,200], index: 0, kind: input, shape index: {}]   ;;  %s2365_s1 = inlined_call_operand.vmem [shape: f32[200,32], index: 1, kind: input, shape index: {}]   ;;  %s2366_s2 = inlined_call_operand.vmem [shape: f32[32,32], index: 2, kind: input, shape index: {}]   ;;  %s2367_s3 = inlined_call_operand.vmem [shape: f32[1,32], index: 3, kind: input, shape index: {}]   ;;  %s2368_s4 = inlined_call_operand.vmem [shape: f32[200,32], index: 4, kind: output, shape index: {}]  }
   0x1   :  { %11 = vsyncpa [#allocation4 + $0x1], 0  ;;  %s1832_s15 = smov 0   ;;  %s1834_s16 = smov 0  }
   0x2   :  { %s1836_s17 = smov 0   ;;  %s1838_s18 = smov 0  }
   0x3   :  { %s1840_s19 = smov 0   ;;  %s1842_s20 = smov 0  }
   0x4   :  { %s1844_s21 = smov 0   ;;  %s1846_s22 = smov 0  }
   0x5   :  { %s1848_s23 = smov 0   ;;  %s1850_s24 = smov 0  }
   0x6 LB: > { %s1171_s25 = sadd.s32 4294967295, %s1768_s24   ;;  %s26_s26 = sadd.s32 1, %s1760_s22  ;;  %s1768_s24 = sphi %s1850_s24, %s17_s24   ;;  %s1764_s23 = sphi %s1848_s23, %s2399_s23   ;;  %s1760_s22 = sphi %s1846_s22, %s2398_s22   ;;  %s1756_s21 = sphi %s1844_s21, %s2397_s21   ;;  %s1752_s20 = sphi %s1842_s20, %s2396_s20   ;;  %s1748_s19 = sphi %s1840_s19, %s2395_s19   ;;  %s1744_s18 = sphi %s1838_s18, %s2394_s18   ;;  %s1740_s17 = sphi %s1836_s17, %s2393_s17   ;;  %s1736_s16 = sphi %s1834_s16, %s2392_s16   ;;  %s1732_s15 = sphi %s1832_s15, %s2391_s15  }
   0x7   : > { %p27_p0 = scmp.ge.s32.totalorder %s26_s26, 2  ;;  %s29_s27 = sadd.s32 1, %s1764_s23 }
   0x8   : > { %s38_s28 = sadd.s32 1, %s1748_s19  ;;  %p45_p1 = scmp.ne.s32.totalorder %s1748_s19, %s1744_s18 }
   0x9   : > { %s2401_s26 = smov (%p27_p0, %s26_s26), 0  ;;  %s2403_s27 = smov (!%p27_p0, %s29_s27), %s1764_s23 }
   0xa   : > { %2371 = sst [smem:[#allocation7_spill]] %s2401_s26  ;;  %s34_s29 = ssub.s32 %s1760_s22, %s2401_s26 }
   0xb   : > { %p46_p2 = scmp.eq.s32.totalorder %s1768_s24, 0  ;;  %p31_p3 = scmp.ge.s32.totalorder %s2403_s27, 2 }
   0xc   : > { %p51_p4 = scmp.ne.s32.totalorder %s1744_s18, %s1740_s17  ;;  %p52_p6 = scmp.eq.s32.totalorder %s1171_s25, 0 }
   0xd   : > { %p1893_p5 = por %p46_p2, %p45_p1  ;;  %s2405_s27 = smov (%p31_p3, %s2403_s27), 0 }
   0xe   : > { %2373 = sst [smem:[#allocation8_spill]] %s2405_s27  ;;  %p1899_p7 = por %p52_p6, %p51_p4 }
   0xf   : > { %s132_s6 = sadd.s32 1, %s1736_s16  ;;  %s33_s7 = ssub.s32 %s1764_s23, %s2405_s27 }
  0x10   : > { %p142_p8 = scmp.ne.s32.totalorder %s1736_s16, %s1732_s15  ;;  %s35_s8 = sor.u32 %s34_s29, %s33_s7 }
  0x11   : > { %p130_p9 = scmp.eq.s32.totalorder %s33_s7, 0  ;;  %p36_p10 = scmp.eq.s32.totalorder %s35_s8, 0 }
  0x12   : > { %p143_p11 = scmp.eq.s32.totalorder %s1171_s25, 3  ;;  %p1174_p13 = scmp.ge.s32.totalorder %s1768_s24, 4 }
  0x13   : > { %s1909_s9 = scalar_select %p130_p9, %s1736_s16, %s132_s6  }
  0x14   : > { %s1912_s10 = scalar_select %p36_p10, %s1748_s19, %s38_s28  }
  0x15   : > { %p1914_p12 = por %p143_p11, %p142_p8  ;;  %171 = sbr.rel (%p1174_p13) target bundleno = 65 (0x41), region = 24 }
  0x1c   : > { %174 = sbr.rel (!%p1893_p5) target bundleno = 65 (0x41), region = 28  ;;  %s175_s12 = sand.u32 (%p1893_p5), 1, %s1748_s19  }
  0x1d   : > { %s1176_s13 = sshll.u32 (%p1893_p5), %s1764_s23, 4  ;;  %s1175_s14 = sshll.u32 (%p1893_p5), %s175_s12, 7 }
  0x1e   : > { %s181_s17 = ssub.s32 (%p1893_p5), 25, %s1176_s13  ;;  %s1926_s29 = scalar_lea.sflag (%p1893_p5), [#allocation4], %s175_s12 }
  0x1f   : > { %p182_p0 = scmp.lt.s32.totalorder (%p1893_p5), %s181_s17, 16  ;;  %s179_s6 = scalar_lea.vmem (%p1893_p5), [#allocation3], %s1175_s14 }
  0x23   : > { %s2407_s17 = smov (!%p182_p0, %s181_s17), 16 }
  0x24   : > { %s1923_s25 = sshll.u32 %s2407_s17, 7 }
  0x25   : > { %s186_s28 = ssub.s32 2048, %s1923_s25 }
  0x26   : > { %187 = vsyncadd %s1926_s29, %s186_s28  ;;  %p1178_p1 = scmp.ne.s32.totalorder %s1923_s25, 0  ;;  %s1257_s30 = sshll.u32 %s1764_s23, 5 }
  0x27   : > { %s190_s7 = sadd.s32 %s1760_s22, %s1257_s30  ;;  %s194_s8 = sshll.u32 %s179_s6, 4  ;;  %s1932_s8 = int_to_ptr.vmem [resolvable:$true] %s194_s8 }
  0x28   : > { %s1180_s13 = sshll.u32 %s190_s7, 7  ;;  %s1630_s6 = scalar_lea.hbm %s2364_s0, 6400 }
  0x29   : > { %s1937_s12 = scalar_lea.hbm %s2364_s0, %s1180_s13 }
  0x2a   : > { %s1626_s14 = scalar_lea.hbm %s1937_s12, %s1923_s25  ;;  %p1631_p5 = scmp.lt.u32.totalorder %s1937_s12, %s2364_s0 }
  0x2b   : > { %p1627_p2 = scmp.ne.s32.totalorder %s1937_s12, %s1626_s14  ;;  %p1632_p6 = scmp.lt.u32.totalorder %s1630_s6, %s1626_s14 }
  0x2c   : > { %p1634_p9 = scmp.lt.u32.totalorder %s1626_s14, %s1937_s12 }
  0x2d   : > { %p1628_p3 = pnand %p1627_p2, %p1178_p1  ;;  %p1633_p8 = por %p1632_p6, %p1631_p5 }
  0x2f   : > { %p1629_p4 = pneg %p1628_p3  ;;  %p1635_p10 = por %p1634_p9, %p1633_p8 }
  0x31   : > { %p1636_p11 = pnand %p1635_p10, %p1629_p4 }
  0x33   : > { %1639 = shalt.err (!%p1636_p11)
}
  0x34   : > { %s1640_s27 = scalar_lea.vmem %s1932_s8, %s1923_s25  ;;  %s1802_s13 = smov [#allocation3]  }
  0x35   : > { %p1641_p13 = scmp.ne.s32.totalorder %s1932_s8, %s1640_s27  ;;  %s1644_s17 = sshll.u32 %s1802_s13, 4  ;;  %s1645_s17 = int_to_ptr.vmem [resolvable:$false] %s1644_s17 }
  0x36   : > { %s1646_s26 = scalar_lea.vmem %s1645_s17, 4096  ;;  %p1647_p3 = scmp.lt.s32.totalorder %s1932_s8, %s1645_s17 }
  0x37   : > { %p1642_p0 = pnand %p1641_p13, %p1178_p1  ;;  %p1648_p5 = scmp.lt.s32.totalorder %s1646_s26, %s1640_s27 }
  0x39   : > { %p1643_p2 = pneg %p1642_p0  ;;  %p1649_p6 = por %p1648_p5, %p1647_p3 }
  0x3b   : > { %p1650_p8 = pnand %p1649_p6, %p1643_p2 }
  0x3d   : > { %1653 = shalt.err (!%p1650_p8)
}
  0x3e   : > { %s1803_s14 = smov 256   ;;  %s1804_s28 = smov 128  }
  0x3f   : > { %s1805_s30 = smov 8  }
  0x40   : > { %200 = dma.hbm_to_vmem [thread:$0]  (%p1178_p1), %s1937_s12, %s1923_s25, %s1932_s8, %s1926_s29, %s1803_s14, %s1804_s28, %s1805_s30  }
  0x41 PF: > { %p1183_p4 = scmp.ge.s32.totalorder %s1768_s24, 1  ;;  %p219_p9 = scmp.lt.s32.totalorder %s1768_s24, 5 }
  0x43   : > { %p220_p10 = pnand %p1183_p4, %p219_p9 }
  0x44   : > { %s225_s6 = sand.u32 (!%p220_p10), 1, %s1744_s18  }
  0x45   : > { %223 = sbr.rel (%p220_p10) target bundleno = 640 (0x280), region = 36  ;;  %s1184_s7 = sshll.u32 (!%p220_p10), %s225_s6, 7 }
  0x46   : > { %s226_s27 = scalar_lea.sflag (!%p220_p10), [#allocation4], %s225_s6  ;;  %s1967_s13 = scalar_lea.vmem (!%p220_p10), [#allocation3], %s1184_s7 }
  0x4c   : > { %1727 = dma.done.wait (%p1899_p7), %s226_s27, 2048  }
  0x4d   : > { %1729 = vsyncadd (%p1899_p7), %s226_s27, 4294965248  ;;  %s259_s25 = sand.u32 1, %s1732_s15   ;;  %s1186_s29 = sshll.u32 %s1752_s20, 4 }
  0x4e   : > { %s1185_s8 = sshll.u32 %s259_s25, 7  ;;  %p272_p1 = scmp.lt.s32.totalorder %s1186_s29, 24 }
  0x4f   : > { %s1980_s28 = scalar_lea.vmem [#allocation5], %s1185_s8   ;;  %p1188_p11 = scmp.ne.s32.totalorder %s1752_s20, 0 }
  0x50   : > { %s2409_s29 = smov (!%p272_p1, %s1186_s29), 24  ;;  %vm290_vm0 = vcmask (!%p1188_p11), 261120   ;;  %v1806_v0 = vmov (!%p1188_p11), 0.0  }
  0x51   : > { %s1187_s12 = sshll.u32 %s2409_s29, 3  ;;  %289 = sbr.rel (%p1188_p11) target bundleno = 89 (0x59), region = 44  ;;  %291 = vst.msk [vmem:[#allocation2] sm:$0xff] (!%p1188_p11), %vm290_vm0, %v1806_v0  ;;  %292 = vst.msk [vmem:[#allocation2 + $0x8] sm:$0xff] (!%p1188_p11), %vm290_vm0, %v1806_v0 }
  0x52   : > { %s1978_s14 = scalar_lea.vmem %s2365_s1, %s1187_s12  ;;  %293 = vst.msk [vmem:[#allocation2 + $0x10] sm:$0xff] (!%p1188_p11), %vm290_vm0, %v1806_v0  ;;  %294 = vst.msk [vmem:[#allocation2 + $0x18] sm:$0xff] (!%p1188_p11), %vm290_vm0, %v1806_v0 }
  0x53   : > { %295 = vst.msk [vmem:[#allocation2 + $0x20] sm:$0xff] (!%p1188_p11), %vm290_vm0, %v1806_v0  ;;  %296 = vst.msk [vmem:[#allocation2 + $0x28] sm:$0xff] (!%p1188_p11), %vm290_vm0, %v1806_v0 }
  0x54   : > { %297 = vst.msk [vmem:[#allocation2 + $0x30] sm:$0xff] (!%p1188_p11), %vm290_vm0, %v1806_v0  ;;  %298 = vst.msk [vmem:[#allocation2 + $0x38] sm:$0xff] (!%p1188_p11), %vm290_vm0, %v1806_v0 }
  0x55   : > { %299 = vst.msk [vmem:[#allocation2 + $0x40] sm:$0xff] (!%p1188_p11), %vm290_vm0, %v1806_v0  ;;  %300 = vst.msk [vmem:[#allocation2 + $0x48] sm:$0xff] (!%p1188_p11), %vm290_vm0, %v1806_v0 }
  0x56   : > { %301 = vst.msk [vmem:[#allocation2 + $0x50] sm:$0xff] (!%p1188_p11), %vm290_vm0, %v1806_v0  ;;  %302 = vst.msk [vmem:[#allocation2 + $0x58] sm:$0xff] (!%p1188_p11), %vm290_vm0, %v1806_v0 }
  0x57   : > { %303 = vst.msk [vmem:[#allocation2 + $0x60] sm:$0xff] (!%p1188_p11), %vm290_vm0, %v1806_v0  ;;  %304 = vst.msk [vmem:[#allocation2 + $0x68] sm:$0xff] (!%p1188_p11), %vm290_vm0, %v1806_v0 }
  0x58   : > { %305 = vst.msk [vmem:[#allocation2 + $0x70] sm:$0xff] %vm290_vm0, %v1806_v0  ;;  %306 = vst.msk [vmem:[#allocation2 + $0x78] sm:$0xff] %vm290_vm0, %v1806_v0 }
  0x59 PF: > { %v323_v1 = vld [vmem:[%s1978_s14] sm:$0xff]  ;;  %v324_v2 = vld [vmem:[%s1978_s14 + $0x8] sm:$0xff]  ;;  %s1189_s15 = sshll.u32 %s1752_s20, 7  ;;  %v340_v3 = vlaneseq  ;;  %v325_v11 = vld [vmem:[%s1978_s14 + $0x10] sm:$0xff]  ;;  %p1222_p7 = scmp.ne.s32.totalorder %s1752_s20, 1 }
  0x5a   : > { %v2002_v4 = vstv %s1189_s15  ;;  %v1401_v6 = vpack.c.bf16 %v324_v2, %v323_v1  ;;  %v326_v12 = vld [vmem:[%s1978_s14 + $0x18] sm:$0xff]  ;;  %v327_v23 = vld [vmem:[%s1978_s14 + $0x20] sm:$0xff]  ;;  %v328_v24 = vld [vmem:[%s1978_s14 + $0x28] sm:$0xff] }
  0x5b   : > { %v2004_v5 = vshrl.u32 %v340_v3, 7  ;;  %v1407_v22 = vpack.c.bf16 %v326_v12, %v325_v11  ;;  %v1413_v30 = vpack.c.bf16 %v328_v24, %v327_v23  ;;  %v341_v31 = vand.u32 127, %v340_v3  ;;  %v329_v33 = vld [vmem:[%s1978_s14 + $0x30] sm:$0xff]  ;;  %v330_v34 = vld [vmem:[%s1978_s14 + $0x38] sm:$0xff]  ;;  %v331_v42 = vld [vmem:[%s1978_s14 + $0x40] sm:$0xff] }
  0x5c   : > { %v1419_v39 = vpack.c.bf16 %v330_v34, %v329_v33  ;;  %v332_v43 = vld [vmem:[%s1978_s14 + $0x48] sm:$0xff]  ;;  %v307_v48 = vld [vmem:[%s1967_s13] sm:$0xff]  ;;  %v333_v52 = vld [vmem:[%s1978_s14 + $0x50] sm:$0xff] }
  0x5d   : > { %v363_v7 = vadd.s32 8, %v2004_v5  ;;  %v378_v8 = vadd.s32 %v2004_v5, %v2002_v4  ;;  %v364_v9 = vadd.s32 16, %v2004_v5  ;;  %v365_v10 = vadd.s32 24, %v2004_v5  ;;  %v315_v49 = vld [vmem:[%s1967_s13 + $0x40] sm:$0xff]  ;;  %v334_v53 = vld [vmem:[%s1978_s14 + $0x58] sm:$0xff]  ;;  %v336_v61 = vld [vmem:[%s1978_s14 + $0x68] sm:$0xff] }
  0x5e   : > { %v366_v13 = vadd.s32 32, %v2004_v5  ;;  %v367_v14 = vadd.s32 40, %v2004_v5  ;;  %v368_v15 = vadd.s32 48, %v2004_v5  ;;  %v369_v16 = vadd.s32 56, %v2004_v5  ;;  %v335_v60 = vld [vmem:[%s1978_s14 + $0x60] sm:$0xff]  ;;  %v337_v1 = vld [vmem:[%s1978_s14 + $0x70] sm:$0xff] }
  0x5f   : > { %v379_v17 = vadd.s32 %v363_v7, %v2002_v4  ;;  %vm394_vm1 = vcmp.lt.s32.totalorder %v378_v8, 200  ;;  %v380_v18 = vadd.s32 %v364_v9, %v2002_v4  ;;  %v381_v19 = vadd.s32 %v365_v10, %v2002_v4  ;;  %v338_v2 = vld [vmem:[%s1978_s14 + $0x78] sm:$0xff]  ;;  %v317_v7 = vld [vmem:[%s1967_s13 + $0x50] sm:$0xff]  ;;  %v311_v10 = vld [vmem:[%s1967_s13 + $0x20] sm:$0xff] }
  0x60   : > { %v382_v20 = vadd.s32 %v366_v13, %v2002_v4  ;;  %v383_v21 = vadd.s32 %v367_v14, %v2002_v4  ;;  %v384_v25 = vadd.s32 %v368_v15, %v2002_v4  ;;  %v370_v26 = vadd.s32 64, %v2004_v5  ;;  %v310_v8 = vld [vmem:[%s1967_s13 + $0x18] sm:$0xff]  ;;  %v319_v11 = vld [vmem:[%s1967_s13 + $0x60] sm:$0xff]  ;;  %v312_v12 = vld [vmem:[%s1967_s13 + $0x28] sm:$0xff] }
  0x61   : > { %vm395_vm2 = vcmp.lt.s32.totalorder %v379_v17, 200  ;;  %vm396_vm3 = vcmp.lt.s32.totalorder %v380_v18, 200  ;;  %vm397_vm4 = vcmp.lt.s32.totalorder %v381_v19, 200  ;;  %v385_v28 = vadd.s32 %v369_v16, %v2002_v4  ;;  %v318_v9 = vld [vmem:[%s1967_s13 + $0x58] sm:$0xff]  ;;  %v320_v13 = vld [vmem:[%s1967_s13 + $0x68] sm:$0xff]  ;;  %v313_v14 = vld [vmem:[%s1967_s13 + $0x30] sm:$0xff] }
  0x62   : > { %vm1402_vm5 = vmpackc.low %vm395_vm2, %vm394_vm1  ;;  %vm398_vm7 = vcmp.lt.s32.totalorder %v382_v20, 200  ;;  %vm399_vm8 = vcmp.lt.s32.totalorder %v383_v21, 200  ;;  %v371_v29 = vadd.s32 72, %v2004_v5  ;;  %vm400_vm10 = vcmp.lt.s32.totalorder %v384_v25, 200  ;;  %v321_v15 = vld [vmem:[%s1967_s13 + $0x70] sm:$0xff]  ;;  %v314_v16 = vld [vmem:[%s1967_s13 + $0x38] sm:$0xff] }
  0x63   : > { %1403 = vmatprep.subr.msk.bf16.mxu0 %vm1402_vm5, %v1401_v6  ;;  %1457 = vmatprep.subr.msk.bf16.mxu1 %vm1402_vm5, %v1401_v6  ;;  %vm2026_vm6 = vmpackc.low %vm397_vm4, %vm396_vm3  ;;  %v386_v35 = vadd.s32 %v370_v26, %v2002_v4  ;;  %vm401_vm11 = vcmp.lt.s32.totalorder %v385_v28, 200  ;;  %v372_v37 = vadd.s32 80, %v2004_v5  ;;  %v373_v38 = vadd.s32 88, %v2004_v5  ;;  %v322_v17 = vld [vmem:[%s1967_s13 + $0x78] sm:$0xff]  ;;  %v427_v18 = vld [vmem:[#allocation2 + $0x8] sm:$0xff] }
  0x64   : > { %1406 = vmatpush3.bf16.msk.msra.mxu0 %vm1402_vm5, %v1401_v6  ;;  %1465 = vmatpush3.bf16.msk.msra.mxu1 %vm1402_vm5, %v1401_v6  ;;  %vm2036_vm9 = vmpackc.low %vm399_vm8, %vm398_vm7  ;;  %v387_v36 = vadd.s32 %v371_v29, %v2002_v4  ;;  %v2055_v40 = vadd.s32 %v2002_v4, %v341_v31  ;;  %v374_v44 = vadd.s32 96, %v2004_v5  ;;  %v375_v45 = vadd.s32 104, %v2004_v5  ;;  %v309_v6 = vld [vmem:[%s1967_s13 + $0x10] sm:$0xff]  ;;  %v435_v19 = vld [vmem:[#allocation2 + $0x48] sm:$0xff] }
  0x65   : > { %1409 = vmatprep.subr.msk.bf16.mxu0 %vm2026_vm6, %v1407_v22  ;;  %1458 = vmatprep.subr.msk.bf16.mxu1 %vm2026_vm6, %v1407_v22  ;;  %vm2057_vm12 = vmpackc.low %vm401_vm11, %vm400_vm10  ;;  %vm402_vm13 = vcmp.lt.s32.totalorder %v386_v35, 200  ;;  %v388_v46 = vadd.s32 %v372_v37, %v2002_v4  ;;  %v389_v47 = vadd.s32 %v373_v38, %v2002_v4  ;;  %v1425_v50 = vpack.c.bf16 %v332_v43, %v331_v42  ;;  %v426_v20 = vld [vmem:[#allocation2] sm:$0xff]  ;;  %v437_v31 = vld [vmem:[#allocation2 + $0x58] sm:$0xff] }
  0x66   : > { %vm403_vm14 = vcmp.lt.s32.totalorder %v387_v36, 200  ;;  %vm344_vm15 = vcmp.lt.s32.totalorder %v2055_v40, 200  ;;  %v390_v54 = vadd.s32 %v374_v44, %v2002_v4  ;;  %v391_v55 = vadd.s32 %v375_v45, %v2002_v4  ;;  %v434_v21 = vld [vmem:[#allocation2 + $0x40] sm:$0xff]  ;;  %v428_v32 = vld [vmem:[#allocation2 + $0x10] sm:$0xff]  ;;  %v431_v42 = vld [vmem:[#allocation2 + $0x28] sm:$0xff] }
  0x67   : > { %vm2078_vm0 = vmpackc.low %vm403_vm14, %vm402_vm13  ;;  %1345 = vmatprep.mubr.msk.f32.mxu0 %vm344_vm15, %v307_v48  ;;  %1357 = vmatprep.mubr.msk.f32.mxu1 %vm344_vm15, %v315_v49  ;;  %vm404_vm1 = vcmp.lt.s32.totalorder %v388_v46, 200  ;;  %vm405_vm2 = vcmp.lt.s32.totalorder %v389_v47, 200  ;;  %v376_v56 = vadd.s32 112, %v2004_v5  ;;  %v377_v57 = vadd.s32 120, %v2004_v5  ;;  %v316_v5 = vld [vmem:[%s1967_s13 + $0x48] sm:$0xff]  ;;  %v436_v33 = vld [vmem:[#allocation2 + $0x50] sm:$0xff] }
  0x68   : > { %1412 = vmatpush3.bf16.msk.msra.mxu0 %vm2026_vm6, %v1407_v22  ;;  %1466 = vmatpush3.bf16.msk.msra.mxu1 %vm2026_vm6, %v1407_v22  ;;  %v1431_v58 = vpack.c.bf16 %v334_v53, %v333_v52  ;;  %vm2100_vm3 = vmpackc.low %vm405_vm2, %vm404_vm1  ;;  %vm406_vm4 = vcmp.lt.s32.totalorder %v390_v54, 200  ;;  %vm407_vm5 = vcmp.lt.s32.totalorder %v391_v55, 200  ;;  %v1437_v0 = vpack.c.bf16 %v336_v61, %v335_v60  ;;  %v439_v43 = vld [vmem:[#allocation2 + $0x68] sm:$0xff]  ;;  %v430_v44 = vld [vmem:[#allocation2 + $0x20] sm:$0xff] }
  0x69   : > { %1415 = vmatprep.subr.msk.bf16.mxu0 %vm2036_vm9, %v1413_v30  ;;  %1459 = vmatprep.subr.msk.bf16.mxu1 %vm2036_vm9, %v1413_v30  ;;  %v392_v62 = vadd.s32 %v376_v56, %v2002_v4  ;;  %v393_v63 = vadd.s32 %v377_v57, %v2002_v4  ;;  %vm1438_vm6 = vmpackc.low %vm407_vm5, %vm406_vm4  ;;  %v1443_v3 = vpack.c.bf16 %v338_v2, %v337_v1  ;;  %v308_v4 = vld [vmem:[%s1967_s13 + $0x8] sm:$0xff]  ;;  %vm603_vm10 = vcmask 261120   ;;  %v438_v45 = vld [vmem:[#allocation2 + $0x60] sm:$0xff] }
  0x6a   : > { %v433_v54 = vld [vmem:[#allocation2 + $0x38] sm:$0xff]  ;;  %v432_v56 = vld [vmem:[#allocation2 + $0x30] sm:$0xff]  ;;  %v640_v2 = vld [vmem:[%s2366_s2] sm:$0xff] (!%p1222_p7) }
  0x6b   : > { %vm408_vm7 = vcmp.lt.s32.totalorder %v392_v62, 200  ;;  %vm409_vm8 = vcmp.lt.s32.totalorder %v393_v63, 200  ;;  %v441_v55 = vld [vmem:[#allocation2 + $0x78] sm:$0xff]  ;;  %v440_v57 = vld [vmem:[#allocation2 + $0x70] sm:$0xff] }
  0x6c   : > { %1418 = vmatpush3.bf16.msk.msra.mxu0 %vm2036_vm9, %v1413_v30  ;;  %1467 = vmatpush3.bf16.msk.msra.mxu1 %vm2036_vm9, %v1413_v30  ;;  %vm1444_vm9 = vmpackc.low %vm409_vm8, %vm408_vm7  ;;  %v429_v30 = vld [vmem:[#allocation2 + $0x18] sm:$0xff] }
  0x6d   : > { %1421 = vmatprep.subr.msk.bf16.mxu0 %vm2057_vm12, %v1419_v39  ;;  %1460 = vmatprep.subr.msk.bf16.mxu1 %vm2057_vm12, %v1419_v39 }
  0x70   : > { %1424 = vmatpush3.bf16.msk.msra.mxu0 %vm2057_vm12, %v1419_v39  ;;  %1468 = vmatpush3.bf16.msk.msra.mxu1 %vm2057_vm12, %v1419_v39 }
  0x71   : > { %1427 = vmatprep.subr.msk.bf16.mxu0 %vm2078_vm0, %v1425_v50  ;;  %1461 = vmatprep.subr.msk.bf16.mxu1 %vm2078_vm0, %v1425_v50 }
  0x74   : > { %1430 = vmatpush3.bf16.msk.msra.mxu0 %vm2078_vm0, %v1425_v50  ;;  %1469 = vmatpush3.bf16.msk.msra.mxu1 %vm2078_vm0, %v1425_v50 }
  0x75   : > { %1433 = vmatprep.subr.msk.bf16.mxu0 %vm2100_vm3, %v1431_v58  ;;  %1462 = vmatprep.subr.msk.bf16.mxu1 %vm2100_vm3, %v1431_v58 }
  0x78   : > { %1436 = vmatpush3.bf16.msk.msra.mxu0 %vm2100_vm3, %v1431_v58  ;;  %1470 = vmatpush3.bf16.msk.msra.mxu1 %vm2100_vm3, %v1431_v58 }
  0x79   : > { %1439 = vmatprep.subr.msk.bf16.mxu0 %vm1438_vm6, %v1437_v0  ;;  %1463 = vmatprep.subr.msk.bf16.mxu1 %vm1438_vm6, %v1437_v0 }
  0x7c   : > { %1442 = vmatpush3.bf16.msk.msra.mxu0 %vm1438_vm6, %v1437_v0  ;;  %1471 = vmatpush3.bf16.msk.msra.mxu1 %vm1438_vm6, %v1437_v0 }
  0x7d   : > { %1445 = vmatprep.subr.msk.bf16.mxu0 %vm1444_vm9, %v1443_v3  ;;  %1464 = vmatprep.subr.msk.bf16.mxu1 %vm1444_vm9, %v1443_v3 }
  0x80   : > { %1448 = vmatpush3.bf16.msk.msra.mxu0 %vm1444_vm9, %v1443_v3  ;;  %1472 = vmatpush3.bf16.msk.msra.mxu1 %vm1444_vm9, %v1443_v3  ;;  %v641_v3 = vld [vmem:[%s2366_s2 + $0x8] sm:$0xff] (!%p1222_p7) }
  0x83   : > { %1346 = vmatmul.mubr.msk.f32.vlgmr.msra.gmra.mrb[0].mxu0 %vm344_vm15, %v308_v4  ;;  %1358 = vmatmul.mubr.msk.f32.vlgmr.msra.gmra.mrb[0].mxu1 %vm344_vm15, %v316_v5  ;;  %v642_v4 = vld [vmem:[%s2366_s2 + $0x10] sm:$0xff] (!%p1222_p7)  ;;  %v1449_v5 = vpack.c.bf16 (!%p1222_p7), %v641_v3, %v640_v2 }
  0x84   : > { %1348 = vmatprep.mubr.msk.f32.mxu0 %vm344_vm15, %v309_v6  ;;  %1360 = vmatprep.mubr.msk.f32.mxu1 %vm344_vm15, %v317_v7  ;;  %v643_v6 = vld [vmem:[%s2366_s2 + $0x18] sm:$0xff] (!%p1222_p7) }
  0x85   : > { %1450 = vmatprep.subr.bf16.mxu0 (!%p1222_p7), %v1449_v5  ;;  %1473 = vmatprep.subr.bf16.mxu1 (!%p1222_p7), %v1449_v5 }
  0x86   : > { %1452 = vmatpush3.bf16.msra.mxu0 (!%p1222_p7), %v1449_v5  ;;  %1475 = vmatpush3.bf16.msra.mxu1 (!%p1222_p7), %v1449_v5 }
  0x87   : > { %1349 = vmatmul.mubr.msk.f32.gmra.mrb[2].mxu0 %vm344_vm15, %v310_v8  ;;  %1361 = vmatmul.mubr.msk.f32.gmra.mrb[2].mxu1 %vm344_vm15, %v318_v9  ;;  %v1453_v9 = vpack.c.bf16 (!%p1222_p7), %v643_v6, %v642_v4 }
  0x88   : > { %1351 = vmatprep.mubr.msk.f32.mxu0 %vm344_vm15, %v311_v10  ;;  %1363 = vmatprep.mubr.msk.f32.mxu1 %vm344_vm15, %v319_v11 }
  0x89   : > { %1454 = vmatprep.subr.bf16.mxu0 (!%p1222_p7), %v1453_v9  ;;  %1474 = vmatprep.subr.bf16.mxu1 (!%p1222_p7), %v1453_v9 }
  0x8a   : > { %1456 = vmatpush3.bf16.msra.mxu0 (!%p1222_p7), %v1453_v9  ;;  %1476 = vmatpush3.bf16.msra.mxu1 (!%p1222_p7), %v1453_v9 }
  0x8b   : > { %1352 = vmatmul.mubr.msk.f32.gmra.mrb[4].mxu0 %vm344_vm15, %v312_v12  ;;  %1364 = vmatmul.mubr.msk.f32.gmra.mrb[4].mxu1 %vm344_vm15, %v320_v13 }
  0x8c   : > { %1354 = vmatprep.mubr.msk.f32.mxu0 %vm344_vm15, %v313_v14  ;;  %1366 = vmatprep.mubr.msk.f32.mxu1 %vm344_vm15, %v321_v15 }
  0x8f   : > { %1355 = vmatmul.mubr.msk.f32.gmra.mrb[6].mxu0 %vm344_vm15, %v314_v16  ;;  %1367 = vmatmul.mubr.msk.f32.gmra.mrb[6].mxu1 %vm344_vm15, %v322_v17 }
 0x156   : > { %v1347_v22 = vpop.f32.mrb[0].mxu0  ;;  %v1359_v23 = vpop.f32.mrb[0].mxu1 }
 0x157   : > { %v588_v24 = vadd.f32 %v1347_v22, %v427_v18  ;;  %v596_v25 = vadd.f32 %v1359_v23, %v435_v19  ;;  %v508_v26 = vpop.f32.mrb[1].mxu0  ;;  %v548_v27 = vpop.f32.mrb[1].mxu1 }
 0x158   : > { %v587_v28 = vadd.f32 %v508_v26, %v426_v20  ;;  %v595_v29 = vadd.f32 %v548_v27, %v434_v21 }
 0x159   : > { %605 = vst.msk [vmem:[#allocation2 + $0x8] sm:$0xff] %vm603_vm10, %v588_v24  ;;  %613 = vst.msk [vmem:[#allocation2 + $0x48] sm:$0xff] %vm603_vm10, %v596_v25  ;;  %v1223_v24 = vld [vmem:[%s2367_s3] ss:$0 sm:$0xff] (!%p1222_p7) }
 0x15a   : > { %604 = vst.msk [vmem:[#allocation2] sm:$0xff] %vm603_vm10, %v587_v28  ;;  %612 = vst.msk [vmem:[#allocation2 + $0x40] sm:$0xff] %vm603_vm10, %v595_v29  ;;  %v1350_v34 = vpop.f32.mrb[2].mxu0  ;;  %v1362_v35 = vpop.f32.mrb[2].mxu1 }
 0x15b   : > { %v590_v36 = vadd.f32 %v1350_v34, %v429_v30  ;;  %v598_v37 = vadd.f32 %v1362_v35, %v437_v31  ;;  %v518_v38 = vpop.f32.mrb[3].mxu0  ;;  %v558_v39 = vpop.f32.mrb[3].mxu1 }
 0x15c   : > { %v589_v40 = vadd.f32 %v518_v38, %v428_v32  ;;  %v597_v41 = vadd.f32 %v558_v39, %v436_v33 }
 0x15d   : > { %607 = vst.msk [vmem:[#allocation2 + $0x18] sm:$0xff] %vm603_vm10, %v590_v36  ;;  %615 = vst.msk [vmem:[#allocation2 + $0x58] sm:$0xff] %vm603_vm10, %v598_v37 }
 0x15e   : > { %606 = vst.msk [vmem:[#allocation2 + $0x10] sm:$0xff] %vm603_vm10, %v589_v40  ;;  %614 = vst.msk [vmem:[#allocation2 + $0x50] sm:$0xff] %vm603_vm10, %v597_v41  ;;  %v1353_v46 = vpop.f32.mrb[4].mxu0  ;;  %v1365_v47 = vpop.f32.mrb[4].mxu1 }
 0x15f   : > { %v592_v48 = vadd.f32 %v1353_v46, %v431_v42  ;;  %v600_v49 = vadd.f32 %v1365_v47, %v439_v43  ;;  %v528_v50 = vpop.f32.mrb[5].mxu0  ;;  %v568_v51 = vpop.f32.mrb[5].mxu1 }
 0x160   : > { %v591_v52 = vadd.f32 %v528_v50, %v430_v44  ;;  %v599_v53 = vadd.f32 %v568_v51, %v438_v45  ;;  %623 = sbr.rel (%p1222_p7) target bundleno = 584 (0x248), region = 48  ;;  %v625_v10 = vld [vmem:[#allocation2 + $0x8] sm:$0xff] (!%p1222_p7) }
 0x161   : > { %609 = vst.msk [vmem:[#allocation2 + $0x28] sm:$0xff] %vm603_vm10, %v592_v48  ;;  %617 = vst.msk [vmem:[#allocation2 + $0x68] sm:$0xff] %vm603_vm10, %v600_v49  ;;  %v624_v7 = vld [vmem:[#allocation2] sm:$0xff] (!%p1222_p7)  ;;  %v633_v11 = vld [vmem:[#allocation2 + $0x48] sm:$0xff] (!%p1222_p7) }
 0x162   : > { %608 = vst.msk [vmem:[#allocation2 + $0x20] sm:$0xff] %vm603_vm10, %v591_v52  ;;  %616 = vst.msk [vmem:[#allocation2 + $0x60] sm:$0xff] %vm603_vm10, %v599_v53  ;;  %v1356_v58 = vpop.f32.mrb[6].mxu0  ;;  %v1368_v59 = vpop.f32.mrb[6].mxu1  ;;  %v632_v8 = vld [vmem:[#allocation2 + $0x40] sm:$0xff] (!%p1222_p7)  ;;  %1377 = vmatprep.mubr.msk.f32.mxu0 (!%p1222_p7), %vm603_vm10, %v624_v7 }
 0x163   : > { %v594_v60 = vadd.f32 %v1356_v58, %v433_v54  ;;  %v602_v61 = vadd.f32 %v1368_v59, %v441_v55  ;;  %v538_v62 = vpop.f32.mrb[7].mxu0  ;;  %v578_v63 = vpop.f32.mrb[7].mxu1  ;;  %1389 = vmatprep.mubr.msk.f32.mxu1 (!%p1222_p7), %vm603_vm10, %v632_v8  ;;  %1378 = vmatmul.mubr.msk.f32.vlgmr.msra.gmra.mrb[0].mxu0 (!%p1222_p7), %vm603_vm10, %v625_v10 }
 0x164   : > { %v593_v0 = vadd.f32 %v538_v62, %v432_v56  ;;  %v601_v1 = vadd.f32 %v578_v63, %v440_v57  ;;  %1390 = vmatmul.mubr.msk.f32.vlgmr.msra.gmra.mrb[0].mxu1 (!%p1222_p7), %vm603_vm10, %v633_v11  ;;  %v627_v14 = vld [vmem:[#allocation2 + $0x18] sm:$0xff] (!%p1222_p7) }
 0x165   : > { %611 = vst.msk [vmem:[#allocation2 + $0x38] sm:$0xff] %vm603_vm10, %v594_v60  ;;  %619 = vst.msk [vmem:[#allocation2 + $0x78] sm:$0xff] %vm603_vm10, %v602_v61  ;;  %v626_v12 = vld [vmem:[#allocation2 + $0x10] sm:$0xff] (!%p1222_p7)  ;;  %v635_v15 = vld [vmem:[#allocation2 + $0x58] sm:$0xff] (!%p1222_p7) }
 0x166   : > { %610 = vst.msk [vmem:[#allocation2 + $0x30] sm:$0xff] %vm603_vm10, %v593_v0  ;;  %618 = vst.msk [vmem:[#allocation2 + $0x70] sm:$0xff] %vm603_vm10, %v601_v1  ;;  %v634_v13 = vld [vmem:[#allocation2 + $0x50] sm:$0xff] (!%p1222_p7)  ;;  %1380 = vmatprep.mubr.msk.f32.mxu0 (!%p1222_p7), %vm603_vm10, %v626_v12 }
 0x167   : > { %1392 = vmatprep.mubr.msk.f32.mxu1 %vm603_vm10, %v634_v13  ;;  %1381 = vmatmul.mubr.msk.f32.gmra.mrb[2].mxu0 %vm603_vm10, %v627_v14 }
 0x168   : > { %1393 = vmatmul.mubr.msk.f32.gmra.mrb[2].mxu1 %vm603_vm10, %v635_v15  ;;  %v629_v18 = vld [vmem:[#allocation2 + $0x28] sm:$0xff] }
 0x169   : > { %v628_v16 = vld [vmem:[#allocation2 + $0x20] sm:$0xff]  ;;  %v637_v19 = vld [vmem:[#allocation2 + $0x68] sm:$0xff] }
 0x16a   : > { %v636_v17 = vld [vmem:[#allocation2 + $0x60] sm:$0xff]  ;;  %1383 = vmatprep.mubr.msk.f32.mxu0 %vm603_vm10, %v628_v16 }
 0x16b   : > { %1395 = vmatprep.mubr.msk.f32.mxu1 %vm603_vm10, %v636_v17  ;;  %1384 = vmatmul.mubr.msk.f32.gmra.mrb[4].mxu0 %vm603_vm10, %v629_v18 }
 0x16c   : > { %1396 = vmatmul.mubr.msk.f32.gmra.mrb[4].mxu1 %vm603_vm10, %v637_v19  ;;  %v631_v22 = vld [vmem:[#allocation2 + $0x38] sm:$0xff] }
 0x16d   : > { %v630_v20 = vld [vmem:[#allocation2 + $0x30] sm:$0xff]  ;;  %v639_v23 = vld [vmem:[#allocation2 + $0x78] sm:$0xff] }
 0x16e   : > { %v638_v21 = vld [vmem:[#allocation2 + $0x70] sm:$0xff]  ;;  %1386 = vmatprep.mubr.msk.f32.mxu0 %vm603_vm10, %v630_v20 }
 0x16f   : > { %1398 = vmatprep.mubr.msk.f32.mxu1 %vm603_vm10, %v638_v21  ;;  %1387 = vmatmul.mubr.msk.f32.gmra.mrb[6].mxu0 %vm603_vm10, %v631_v22 }
 0x170   : > { %1399 = vmatmul.mubr.msk.f32.gmra.mrb[6].mxu1 %vm603_vm10, %v639_v23 }
 0x236   : > { %v1379_v25 = vpop.f32.mrb[0].mxu0 }
 0x237   : > { %v1391_v26 = vpop.f32.mrb[0].mxu1  ;;  %v771_v27 = vadd.f32 %v1379_v25, %v1223_v24  ;;  %v765_v29 = vpop.f32.mrb[1].mxu0 }
 0x238   : > { %v811_v28 = vadd.f32 %v1391_v26, %v1223_v24  ;;  %v805_v30 = vpop.f32.mrb[1].mxu1  ;;  %v766_v31 = vadd.f32 %v1223_v24, %v765_v29 }
 0x239   : > { %v806_v32 = vadd.f32 %v1223_v24, %v805_v30  ;;  %845 = vst.msk [vmem:[%s1980_s28 + $0x8] sm:$0xff] %vm603_vm10, %v771_v27 }
 0x23a   : > { %853 = vst.msk [vmem:[%s1980_s28 + $0x48] sm:$0xff] %vm603_vm10, %v811_v28  ;;  %844 = vst.msk [vmem:[%s1980_s28] sm:$0xff] %vm603_vm10, %v766_v31  ;;  %v1382_v33 = vpop.f32.mrb[2].mxu0 }
 0x23b   : > { %852 = vst.msk [vmem:[%s1980_s28 + $0x40] sm:$0xff] %vm603_vm10, %v806_v32  ;;  %v1394_v34 = vpop.f32.mrb[2].mxu1  ;;  %v781_v35 = vadd.f32 %v1382_v33, %v1223_v24  ;;  %v775_v37 = vpop.f32.mrb[3].mxu0 }
 0x23c   : > { %v821_v36 = vadd.f32 %v1394_v34, %v1223_v24  ;;  %v815_v38 = vpop.f32.mrb[3].mxu1  ;;  %v776_v39 = vadd.f32 %v1223_v24, %v775_v37 }
 0x23d   : > { %v816_v40 = vadd.f32 %v1223_v24, %v815_v38  ;;  %847 = vst.msk [vmem:[%s1980_s28 + $0x18] sm:$0xff] %vm603_vm10, %v781_v35 }
 0x23e   : > { %855 = vst.msk [vmem:[%s1980_s28 + $0x58] sm:$0xff] %vm603_vm10, %v821_v36  ;;  %846 = vst.msk [vmem:[%s1980_s28 + $0x10] sm:$0xff] %vm603_vm10, %v776_v39  ;;  %v1385_v41 = vpop.f32.mrb[4].mxu0 }
 0x23f   : > { %854 = vst.msk [vmem:[%s1980_s28 + $0x50] sm:$0xff] %vm603_vm10, %v816_v40  ;;  %v1397_v42 = vpop.f32.mrb[4].mxu1  ;;  %v791_v43 = vadd.f32 %v1385_v41, %v1223_v24  ;;  %v785_v45 = vpop.f32.mrb[5].mxu0 }
 0x240   : > { %v831_v44 = vadd.f32 %v1397_v42, %v1223_v24  ;;  %v825_v46 = vpop.f32.mrb[5].mxu1  ;;  %v786_v47 = vadd.f32 %v1223_v24, %v785_v45 }
 0x241   : > { %v826_v48 = vadd.f32 %v1223_v24, %v825_v46  ;;  %849 = vst.msk [vmem:[%s1980_s28 + $0x28] sm:$0xff] %vm603_vm10, %v791_v43 }
 0x242   : > { %857 = vst.msk [vmem:[%s1980_s28 + $0x68] sm:$0xff] %vm603_vm10, %v831_v44  ;;  %848 = vst.msk [vmem:[%s1980_s28 + $0x20] sm:$0xff] %vm603_vm10, %v786_v47  ;;  %v1388_v49 = vpop.f32.mrb[6].mxu0 }
 0x243   : > { %856 = vst.msk [vmem:[%s1980_s28 + $0x60] sm:$0xff] %vm603_vm10, %v826_v48  ;;  %v1400_v50 = vpop.f32.mrb[6].mxu1  ;;  %v801_v51 = vadd.f32 %v1388_v49, %v1223_v24  ;;  %v795_v53 = vpop.f32.mrb[7].mxu0 }
 0x244   : > { %v841_v52 = vadd.f32 %v1400_v50, %v1223_v24  ;;  %v835_v54 = vpop.f32.mrb[7].mxu1  ;;  %v796_v55 = vadd.f32 %v1223_v24, %v795_v53 }
 0x245   : > { %v836_v56 = vadd.f32 %v1223_v24, %v835_v54  ;;  %851 = vst.msk [vmem:[%s1980_s28 + $0x38] sm:$0xff] %vm603_vm10, %v801_v51 }
 0x246   : > { %859 = vst.msk [vmem:[%s1980_s28 + $0x78] sm:$0xff] %vm603_vm10, %v841_v52  ;;  %850 = vst.msk [vmem:[%s1980_s28 + $0x30] sm:$0xff] %vm603_vm10, %v796_v55 }
 0x247   : > { %858 = vst.msk [vmem:[%s1980_s28 + $0x70] sm:$0xff] %vm603_vm10, %v836_v56 }
 0x248 PF: > { %866 = sbr.rel (!%p1914_p12) target bundleno = 640 (0x280), region = 52  ;;  %s1241_s12 = sshll.u32 (%p1914_p12), %s1756_s21, 4 }
 0x249   : > { %s1258_s17 = sshll.u32 (%p1914_p12), %s1756_s21, 7  ;;  %s868_s26 = ssub.s32 (%p1914_p12), 25, %s1241_s12 }
 0x24a   : > { %s2251_s5 = scalar_lea.vmem (%p1914_p12), %s2368_s4, %s1258_s17   ;;  %p869_p13 = scmp.lt.s32.totalorder (%p1914_p12), %s868_s26, 16 }
 0x24f   : > { %s2411_s26 = smov (!%p869_p13, %s868_s26), 16 }
 0x250   : > { %s1242_s30 = sshll.u32 %s2411_s26, 7 }
 0x251   : > { %p1245_p0 = scmp.eq.s32.totalorder %s1242_s30, 0 }
 0x252   : > { %s2257_s11 = sshrl.u32 (!%p1245_p0), %s2411_s26, 4 }
 0x253   : > { %877 = sbr.rel (%p1245_p0) target bundleno = 640 (0x280), region = 56  ;;  %p1246_p12 = scmp.le.s32.totalorder (!%p1245_p0), %s2257_s11, 0 }
 0x25a   : > { %1107 = sbr.rel (%p1246_p12) target bundleno = 619 (0x26b), region = 141  ;;  %s2386_s21 = smov (!%p1246_p12), %s2251_s5 }
 0x25b   : > { %s2387_s6 = smov (!%p1246_p12), %s1980_s28  ;;  %s2266_s7 = smov (!%p1246_p12), 0  }
 0x25c   : > { %s2268_s27 = smov (!%p1246_p12), 0  }
 0x261 LB: >> { %v969_v57 = vld [vmem:[%s1776_s6] sm:$0xff]  ;;  %v971_v58 = vld [vmem:[%s1776_s6 + $0x8] sm:$0xff]  ;;  %v973_v59 = vld [vmem:[%s1776_s6 + $0x10] sm:$0xff]  ;;  %s1001_s13 = sadd.s32 1, %s1780_s7  ;;  %s963_s27 = sadd.s32 1, %s1784_s27   ;;  %s1784_s27 = sphi %s2268_s27, %s963_s27   ;;  %s1780_s7 = sphi %s2266_s7, %s2388_s7   ;;  %s1776_s6 = sphi %s2387_s6, %s1006_s6   ;;  %s1772_s21 = sphi %s2386_s21, %s1007_s21  }
 0x262   : >> { %970 = vst [vmem:[%s1772_s21] sm:$0xff] %v969_v57  ;;  %972 = vst [vmem:[%s1772_s21 + $0x8] sm:$0xff] %v971_v58  ;;  %v975_v60 = vld [vmem:[%s1776_s6 + $0x18] sm:$0xff]  ;;  %v977_v61 = vld [vmem:[%s1776_s6 + $0x20] sm:$0xff]  ;;  %p1002_p2 = scmp.ge.s32.totalorder %s1001_s13, %s2257_s11  ;;  %p962_p3 = scmp.ge.s32.totalorder %s963_s27, %s2257_s11 }
 0x263   : >> { %974 = vst [vmem:[%s1772_s21 + $0x10] sm:$0xff] %v973_v59  ;;  %v979_v62 = vld [vmem:[%s1776_s6 + $0x28] sm:$0xff]  ;;  %976 = vst [vmem:[%s1772_s21 + $0x18] sm:$0xff] %v975_v60  ;;  %v981_v63 = vld [vmem:[%s1776_s6 + $0x30] sm:$0xff] }
 0x264   : >> { %978 = vst [vmem:[%s1772_s21 + $0x20] sm:$0xff] %v977_v61  ;;  %980 = vst [vmem:[%s1772_s21 + $0x28] sm:$0xff] %v979_v62  ;;  %v983_v0 = vld [vmem:[%s1776_s6 + $0x38] sm:$0xff]  ;;  %v985_v1 = vld [vmem:[%s1776_s6 + $0x40] sm:$0xff]  ;;  %s2413_s13 = smov (%p1002_p2, %s1001_s13), 0  ;;  %965 = sbr.rel (!%p962_p3) target bundleno = 609 (0x261), region = 147 }
 0x265   : >> { %982 = vst [vmem:[%s1772_s21 + $0x30] sm:$0xff] %v981_v63  ;;  %984 = vst [vmem:[%s1772_s21 + $0x38] sm:$0xff] %v983_v0  ;;  %v987_v2 = vld [vmem:[%s1776_s6 + $0x48] sm:$0xff]  ;;  %v989_v3 = vld [vmem:[%s1776_s6 + $0x50] sm:$0xff]  ;;  %s1247_s25 = sshll.u32 %s2413_s13, 7  ;;  %s2388_s7 = smov %s2413_s13 }
 0x266   : >> { %986 = vst [vmem:[%s1772_s21 + $0x40] sm:$0xff] %v985_v1  ;;  %v991_v4 = vld [vmem:[%s1776_s6 + $0x58] sm:$0xff]  ;;  %988 = vst [vmem:[%s1772_s21 + $0x48] sm:$0xff] %v987_v2  ;;  %v993_v5 = vld [vmem:[%s1776_s6 + $0x60] sm:$0xff] }
 0x267   : >> { %990 = vst [vmem:[%s1772_s21 + $0x50] sm:$0xff] %v989_v3  ;;  %992 = vst [vmem:[%s1772_s21 + $0x58] sm:$0xff] %v991_v4  ;;  %v995_v6 = vld [vmem:[%s1776_s6 + $0x68] sm:$0xff]  ;;  %v997_v7 = vld [vmem:[%s1776_s6 + $0x70] sm:$0xff] }
 0x268   : >> { %994 = vst [vmem:[%s1772_s21 + $0x60] sm:$0xff] %v993_v5  ;;  %996 = vst [vmem:[%s1772_s21 + $0x68] sm:$0xff] %v995_v6  ;;  %v999_v8 = vld [vmem:[%s1776_s6 + $0x78] sm:$0xff]  ;;  %s1006_s6 = scalar_lea.vmem %s1980_s28, %s1247_s25 [#allocation5]  }
 0x269   : >> { %998 = vst [vmem:[%s1772_s21 + $0x70] sm:$0xff] %v997_v7  ;;  %1000 = vst [vmem:[%s1772_s21 + $0x78] sm:$0xff] %v999_v8  ;;  %s1007_s21 = scalar_lea.vmem %s2251_s5, %s1247_s25  }
 0x26b PF: > { %s2326_s29 = sand.u32 15, %s2411_s26   ;;  %s1259_s20 = sshll.u32 %s2257_s11, 7 }
 0x26c   : > { %s1012_s8 = scalar_lea.vmem %s1980_s28, %s1259_s20 [#allocation5]   ;;  %s1014_s12 = scalar_lea.vmem %s2251_s5, %s1259_s20  }
 0x26d   : > { %p1252_p5 = scmp.le.s32.totalorder %s2326_s29, 0 }
 0x26e   : > { %s1786_s17 = smov (!%p1252_p5), %s1014_s12   ;;  %s1790_s14 = smov (!%p1252_p5), %s1012_s8  }
 0x26f   : > { %1121 = sbr.rel (%p1252_p5) target bundleno = 640 (0x280), region = 152  ;;  %s1794_s15 = smov (!%p1252_p5), 0  }
 0x270   : > { %s1798_s30 = smov (!%p1252_p5), 0  }
 0x276 LB: >> { %v1024_v9 = vld [vmem:[%s1792_s14] sm:$0xff]  ;;  %s1026_s26 = sadd.s32 1, %s1796_s15  ;;  %s1018_s30 = sadd.s32 1, %s1800_s30   ;;  %s1800_s30 = sphi %s1798_s30, %s1018_s30   ;;  %s1796_s15 = sphi %s1794_s15, %s1795_s15   ;;  %s1792_s14 = sphi %s1790_s14, %s1031_s14   ;;  %s1788_s17 = sphi %s1786_s17, %s1032_s17  }
 0x277   : >> { %1025 = vst [vmem:[%s1788_s17] sm:$0xff] %v1024_v9  ;;  %p1027_p6 = scmp.ge.s32.totalorder %s1026_s26, %s2326_s29  ;;  %p1017_p8 = scmp.ge.s32.totalorder %s1018_s30, %s2326_s29 }
 0x279   : >> { %s2415_s26 = smov (%p1027_p6, %s1026_s26), 0  ;;  %1020 = sbr.rel (!%p1017_p8) target bundleno = 630 (0x276), region = 158 }
 0x27a   : >> { %s1253_s28 = sshll.u32 %s2415_s26, 3  ;;  %s1795_s15 = smov %s2415_s26  }
 0x27b   : >> { %s1031_s14 = scalar_lea.vmem %s1012_s8, %s1253_s28 [#allocation5]   ;;  %s1032_s17 = scalar_lea.vmem %s1014_s12, %s1253_s28  }
 0x280 PF: > { %s17_s24 = sadd.s32 1, %s1768_s24   ;;  %s2389_s5 = sld [smem:[#allocation7_spill]] }
 0x281   : > { %p14_p4 = scmp.ge.s32.totalorder %s17_s24, 6   ;;  %s2390_s11 = sld [smem:[#allocation8_spill]] }
 0x282   : > { %s2391_s15 = smov %s1736_s16  ;;  %s2392_s16 = smov %s1909_s9 }
 0x283   : > { %s2393_s17 = smov %s1744_s18  ;;  %s2394_s18 = smov %s1748_s19 }
 0x284   : > { %s2395_s19 = smov %s1912_s10  ;;  %s2396_s20 = smov %s1760_s22 }
 0x285   : > { %s2397_s21 = smov %s1764_s23  ;;  %16 = sbr.rel (!%p14_p4) target bundleno = 6 (0x6), region = 169 }
 0x286   : > { %s2398_s22 = smov %s2389_s5 }
 0x287   : > { %s2399_s23 = smov %s2390_s11 }
 0x28c   :  { %1048 = vsyncpa [#allocation4], 1 }
 0x28d   :  { %1050 = vsyncpa [#allocation4 + $0x1], 1 }

</bundles_post_ra>
